<compile_context>
chip_gen: v7x
topology: tpu7x:2x2x1
jax: 0.10.0
libtpu: 0.0.40
codegen_flags: <defaults>
</compile_context>

<pallas_src>
from typing import NamedTuple

import jax
import jax.numpy as jnp
from jax.experimental import pallas as pl
from jax.experimental.pallas import tpu as pltpu

H1 = 128
H2 = 64
LANE = 128                 # class dim padded to a multiple of this (lane-dense store)
ROW_ALIGN = 16             # bf16 sublane packing -> row tiles multiple of 16
MAX_TILE = 4096            # keeps double-buffered tiles comfortably under 32 MiB VMEM
MIN_ROWS_FOR_SPLIT = 1024  # force >= 2 row tiles (v7x megacore) above this N
NEG_BIG = -1e30            # effectively -inf for padded class columns


def _cdiv(a, b):
    return -(-a // b)


def _round_up(a, b):
    return _cdiv(a, b) * b


def mlp_kernel(x_ref, w1_ref, b1_ref, w2_ref, b2_ref, w3_ref, b3_ref, o_ref):
    # fc1 + ReLU  (bf16 operands on the MXU, f32 accumulation)
    h1 = jnp.dot(x_ref[...], w1_ref[...],
                 preferred_element_type=jnp.float32) + b1_ref[...]
    h1 = jnp.maximum(h1, 0.0)

    # (dropout(0.3): identity in eval mode)

    # fc2 + ReLU
    h2 = jnp.dot(h1.astype(jnp.bfloat16), w2_ref[...],
                 preferred_element_type=jnp.float32) + b2_ref[...]
    h2 = jnp.maximum(h2, 0.0)

    # fc3: padded W3 columns are zero and the corresponding b3 columns are
    # NEG_BIG, so padded logits come out at NEG_BIG -- no iota/where mask here.
    logits = jnp.dot(h2.astype(jnp.bfloat16), w3_ref[...],
                     preferred_element_type=jnp.float32) + b3_ref[...]

    # log_softmax along the class axis (f32, max-shifted; padded columns
    # contribute exp(NEG_BIG - m) == 0 to the normalization).
    # TODO(synk): if profiles show the XLU lane reductions (max/sum) as the
    # saturating slot on v6e/v7x, replace the jnp.sum with an MXU dot of
    # exp(shifted) against a ones((out_pad, 1)) column.
    m = jnp.max(logits, axis=1, keepdims=True)
    shifted = logits - m
    lse = jnp.log(jnp.sum(jnp.exp(shifted), axis=1, keepdims=True))
    o_ref[...] = (shifted - lse).astype(o_ref.dtype)


class PreparedParams(NamedTuple):
    w1: jax.Array          # (in_f, H1)      bf16
    b1: jax.Array          # (1, H1)         f32
    w2: jax.Array          # (H1, H2)        bf16
    b2: jax.Array          # (1, H2)         f32
    w3: jax.Array          # (H2, out_pad)   bf16, zero-padded class columns
    b3: jax.Array          # (1, out_pad)    f32, padded columns = NEG_BIG
    in_features: int
    out_features: int
    out_pad: int


def prepare_params(params):
    """One-time preprocessing: bf16 casts + lane-dense class padding with the
    softmax mask baked into b3. Hoisted out of the per-call forward."""
    w1, b1, w2, b2, w3, b3 = params
    in_f = int(w1.shape[0])
    out_f = int(w3.shape[1])
    assert w1.shape[1] == H1, w1.shape
    assert b1.shape[-1] == H1, b1.shape
    assert w2.shape == (H1, H2), w2.shape
    assert b2.shape[-1] == H2, b2.shape
    assert w3.shape[0] == H2, w3.shape
    out_pad = _round_up(max(out_f, 1), LANE)

    w1_b = w1.astype(jnp.bfloat16)
    w2_b = w2.astype(jnp.bfloat16)
    w3_b = jnp.zeros((H2, out_pad), jnp.bfloat16).at[:, :out_f].set(
        w3.astype(jnp.bfloat16))
    b3_p = jnp.full((1, out_pad), NEG_BIG, jnp.float32).at[:, :out_f].set(
        jnp.reshape(b3, (1, out_f)).astype(jnp.float32))
    return PreparedParams(
        w1_b, jnp.reshape(b1, (1, H1)).astype(jnp.float32),
        w2_b, jnp.reshape(b2, (1, H2)).astype(jnp.float32),
        w3_b, b3_p, in_f, out_f, out_pad)


def _choose_tiling(n, tile_n):
    """Balanced row tiles: minimal padding waste, >= 2 tiles for large N so the
    'parallel' grid axis can be sharded across both v7x TensorCores."""
    tile_n = max(ROW_ALIGN, min(int(tile_n), MAX_TILE))
    num_tiles = _cdiv(n, tile_n)
    if num_tiles < 2 and n >= MIN_ROWS_FOR_SPLIT:
        num_tiles = 2
    tile = _round_up(_cdiv(n, num_tiles), ROW_ALIGN)
    return tile, num_tiles * tile, num_tiles


def mlp_classifier_forward_padded(x, prep: PreparedParams, *,
                                  tile_n=2048, out_dtype=jnp.float32):
    """Returns the padded (n_pad, out_pad) log-prob buffer without the extra
    slice copy. Rows >= x.shape[0] and columns >= prep.out_features are padding."""
    n, in_f = x.shape
    assert in_f == prep.in_features, (in_f, prep.in_features)
    out_pad = prep.out_pad

    tile, n_pad, num_tiles = _choose_tiling(n, tile_n)

    # Stream x as bf16 (halves x DMA bytes, native MXU operand path).
    x_p = x.astype(jnp.bfloat16)
    if n_pad != n:
        x_p = jnp.pad(x_p, ((0, n_pad - n), (0, 0)))

    out_bytes = jnp.dtype(out_dtype).itemsize
    weight_bytes = ((prep.w1.size + prep.w2.size + prep.w3.size) * 2
                    + (prep.b1.size + prep.b2.size + prep.b3.size) * 4)
    cost = pl.CostEstimate(
        flops=2 * n_pad * (in_f * H1 + H1 * H2 + H2 * out_pad),
        transcendentals=n_pad * out_pad,
        bytes_accessed=(n_pad * in_f * 2 + n_pad * out_pad * out_bytes
                        + weight_bytes),
    )

    return pl.pallas_call(
        mlp_kernel,
        out_shape=jax.ShapeDtypeStruct((n_pad, out_pad), out_dtype),
        grid_spec=pltpu.PrefetchScalarGridSpec(
            num_scalar_prefetch=0,
            grid=(num_tiles,),
            in_specs=[
                pl.BlockSpec((tile, in_f), lambda i: (i, 0)),    # x row-tile (bf16)
                pl.BlockSpec((in_f, H1), lambda i: (0, 0)),      # W1 (resident)
                pl.BlockSpec((1, H1), lambda i: (0, 0)),         # b1
                pl.BlockSpec((H1, H2), lambda i: (0, 0)),        # W2 (resident)
                pl.BlockSpec((1, H2), lambda i: (0, 0)),         # b2
                pl.BlockSpec((H2, out_pad), lambda i: (0, 0)),   # W3 (padded, resident)
                pl.BlockSpec((1, out_pad), lambda i: (0, 0)),    # b3 (padded, mask baked in)
            ],
            out_specs=pl.BlockSpec((tile, out_pad), lambda i: (i, 0)),
        ),
        compiler_params=pltpu.CompilerParams(
            dimension_semantics=("parallel",),
            vmem_limit_bytes=32 * 1024 * 1024,
        ),
        cost_estimate=cost,
    )(x_p, prep.w1, prep.b1, prep.w2, prep.b2, prep.w3, prep.b3)


def mlp_classifier_forward(x, prep: PreparedParams, *,
                           tile_n=2048, out_dtype=jnp.float32):
    """Convenience wrapper: slices off row/class padding.
    Perf-critical callers should consume the padded buffer directly (see
    mlp_classifier_forward_padded) so the slice fuses at the consumer instead
    of re-reading the whole output."""
    out = mlp_classifier_forward_padded(x, prep, tile_n=tile_n, out_dtype=out_dtype)
    return out[:x.shape[0], :prep.out_features]


def init_params(key, in_channels, out_channels):
    """Deterministic init mimicking nn.Linear's U(-1/sqrt(fan_in), 1/sqrt(fan_in)).
    Weights are stored pre-transposed: (in_features, out_features)."""
    ks = jax.random.split(key, 6)

    def linear(kw, kb, fan_in, fan_out):
        bound = 1.0 / jnp.sqrt(jnp.float32(fan_in))
        w = jax.random.uniform(kw, (fan_in, fan_out), jnp.float32, -bound, bound)
        b = jax.random.uniform(kb, (1, fan_out), jnp.float32, -bound, bound)
        return w, b

    w1, b1 = linear(ks[0], ks[1], in_channels, H1)
    w2, b2 = linear(ks[2], ks[3], H1, H2)
    w3, b3 = linear(ks[4], ks[5], H2, out_channels)
    return (w1, b1, w2, b2, w3, b3)


def reference_forward_bf16(x, params):
    """Pure-JAX reference mirroring the kernel's bf16-operand / f32-accumulate path."""
    w1, b1, w2, b2, w3, b3 = params
    xb = x.astype(jnp.bfloat16)
    h1 = jnp.maximum(jnp.dot(xb, w1.astype(jnp.bfloat16),
                             preferred_element_type=jnp.float32) + b1, 0.0)
    h2 = jnp.maximum(jnp.dot(h1.astype(jnp.bfloat16), w2.astype(jnp.bfloat16),
                             preferred_element_type=jnp.float32) + b2, 0.0)
    z = jnp.dot(h2.astype(jnp.bfloat16), w3.astype(jnp.bfloat16),
                preferred_element_type=jnp.float32) + b3
    return z - jax.scipy.special.logsumexp(z, axis=1, keepdims=True)


def reference_forward_f32(x, params):
    """Full-precision reference matching the original PyTorch module semantics."""
    w1, b1, w2, b2, w3, b3 = params
    h1 = jnp.maximum(x @ w1 + b1, 0.0)
    h2 = jnp.maximum(h1 @ w2 + b2, 0.0)
    z = h2 @ w3 + b3
    return z - jax.scipy.special.logsumexp(z, axis=1, keepdims=True)


if __name__ == "__main__":
    key = jax.random.PRNGKey(0)
    k_x, k_p = jax.random.split(key)

    num_nodes = 16        # N (rows of data.x)
    in_channels = 16
    out_channels = 10

    x = jax.random.normal(k_x, (num_nodes, in_channels), jnp.float32)
    params = init_params(k_p, in_channels, out_channels)
    prep = prepare_params(params)   # one-time weight preprocessing

    # --- f32 output path (tight checks) ---
    out = mlp_classifier_forward(x, prep)
    out = jax.block_until_ready(out)
    assert out.shape == (num_nodes, out_channels)

    # Tight check against a reference with identical bf16 quantization.
    ref_bf16 = reference_forward_bf16(x, params)
    assert jnp.allclose(out, ref_bf16, atol=2e-3, rtol=2e-3), "mismatch vs bf16 reference"

    # Loose check against the full-f32 module semantics (bf16 streaming noise only).
    ref_f32 = reference_forward_f32(x, params)
    assert jnp.allclose(out, ref_f32, atol=5e-2, rtol=5e-2), "mismatch vs f32 reference"

    # log_softmax rows should exponentiate-sum to ~1
    assert jnp.allclose(jnp.exp(out).sum(axis=1), 1.0, atol=1e-4)

    # --- bf16 output path (halves output HBM traffic; looser checks) ---
    out_b = mlp_classifier_forward(x, prep, out_dtype=jnp.bfloat16)
    out_b = jax.block_until_ready(out_b).astype(jnp.float32)
    assert out_b.shape == (num_nodes, out_channels)
    assert jnp.allclose(out_b, ref_bf16, atol=2e-2, rtol=1e-2), \
        "mismatch vs bf16 reference (bf16 store)"
    assert jnp.allclose(jnp.exp(out_b).sum(axis=1), 1.0, atol=1e-2)

    print("KERNEL_OK")
</pallas_src>

<mosaic_0001>
module attributes {stable_mosaic.version = 11 : i64} {
  func.func @mlp_kernel(%arg0: i32, %arg1: memref<16x16xbf16, #tpu.memory_space<vmem>>, %arg2: memref<16x128xbf16, #tpu.memory_space<vmem>>, %arg3: memref<1x128xf32, #tpu.memory_space<vmem>>, %arg4: memref<128x64xbf16, #tpu.memory_space<vmem>>, %arg5: memref<1x64xf32, #tpu.memory_space<vmem>>, %arg6: memref<64x128xbf16, #tpu.memory_space<vmem>>, %arg7: memref<1x128xf32, #tpu.memory_space<vmem>>, %arg8: memref<16x128xf32, #tpu.memory_space<vmem>>) attributes {dimension_semantics = [#tpu.dimension_semantics<parallel>], iteration_bounds = array<i64: 1>, scalar_prefetch = 0 : i64, scratch_operands = 0 : i64, tpu.core_type = #tpu.core_type<tc>, window_params = [{transform_indices = @transform_0, window_bounds = array<i64: 16, 16>}, {pipeline_mode = #tpu.pipeline_mode<synchronous>, transform_indices = @transform_1, window_bounds = array<i64: 16, 128>}, {pipeline_mode = #tpu.pipeline_mode<synchronous>, transform_indices = @transform_2, window_bounds = array<i64: 1, 128>}, {pipeline_mode = #tpu.pipeline_mode<synchronous>, transform_indices = @transform_3, window_bounds = array<i64: 128, 64>}, {pipeline_mode = #tpu.pipeline_mode<synchronous>, transform_indices = @transform_4, window_bounds = array<i64: 1, 64>}, {pipeline_mode = #tpu.pipeline_mode<synchronous>, transform_indices = @transform_5, window_bounds = array<i64: 64, 128>}, {pipeline_mode = #tpu.pipeline_mode<synchronous>, transform_indices = @transform_6, window_bounds = array<i64: 1, 128>}, {transform_indices = @transform_7, window_bounds = array<i64: 16, 128>}]} {
    %c0 = arith.constant 0 : index
    %c0_0 = arith.constant 0 : index
    %0 = vector.load %arg1[%c0, %c0_0] : memref<16x16xbf16, #tpu.memory_space<vmem>>, vector<16x16xbf16>
    %c0_1 = arith.constant 0 : index
    %c0_2 = arith.constant 0 : index
    %1 = vector.load %arg2[%c0_1, %c0_2] : memref<16x128xbf16, #tpu.memory_space<vmem>>, vector<16x128xbf16>
    %cst = arith.constant dense<0.000000e+00> : vector<16x128xf32>
    %2 = tpu.matmul %0, %1, %cst {dimension_numbers = #tpu.dot_dimension_numbers<[1], [0], [0], [1], [0, 0, 1, 1], [], []>} : vector<16x16xbf16>, vector<16x128xbf16>, vector<16x128xf32> -> vector<16x128xf32>
    %c0_3 = arith.constant 0 : index
    %c0_4 = arith.constant 0 : index
    %3 = vector.load %arg3[%c0_3, %c0_4] : memref<1x128xf32, #tpu.memory_space<vmem>>, vector<1x128xf32>
    %4 = vector.broadcast %3 : vector<1x128xf32> to vector<16x128xf32>
    %5 = arith.addf %2, %4 : vector<16x128xf32>
    %cst_5 = arith.constant 0.000000e+00 : f32
    %6 = vector.broadcast %cst_5 : f32 to vector<16x128xf32>
    %7 = arith.maximumf %5, %6 : vector<16x128xf32>
    %8 = arith.truncf %7 : vector<16x128xf32> to vector<16x128xbf16>
    %c0_6 = arith.constant 0 : index
    %c0_7 = arith.constant 0 : index
    %9 = vector.load %arg4[%c0_6, %c0_7] : memref<128x64xbf16, #tpu.memory_space<vmem>>, vector<128x64xbf16>
    %cst_8 = arith.constant dense<0.000000e+00> : vector<16x64xf32>
    %10 = tpu.matmul %8, %9, %cst_8 {dimension_numbers = #tpu.dot_dimension_numbers<[1], [0], [0], [1], [0, 0, 1, 1], [], []>} : vector<16x128xbf16>, vector<128x64xbf16>, vector<16x64xf32> -> vector<16x64xf32>
    %c0_9 = arith.constant 0 : index
    %c0_10 = arith.constant 0 : index
    %11 = vector.load %arg5[%c0_9, %c0_10] : memref<1x64xf32, #tpu.memory_space<vmem>>, vector<1x64xf32>
    %12 = vector.broadcast %11 : vector<1x64xf32> to vector<16x64xf32>
    %13 = arith.addf %10, %12 : vector<16x64xf32>
    %cst_11 = arith.constant 0.000000e+00 : f32
    %14 = vector.broadcast %cst_11 : f32 to vector<16x64xf32>
    %15 = arith.maximumf %13, %14 : vector<16x64xf32>
    %16 = arith.truncf %15 : vector<16x64xf32> to vector<16x64xbf16>
    %c0_12 = arith.constant 0 : index
    %c0_13 = arith.constant 0 : index
    %17 = vector.load %arg6[%c0_12, %c0_13] : memref<64x128xbf16, #tpu.memory_space<vmem>>, vector<64x128xbf16>
    %cst_14 = arith.constant dense<0.000000e+00> : vector<16x128xf32>
    %18 = tpu.matmul %16, %17, %cst_14 {dimension_numbers = #tpu.dot_dimension_numbers<[1], [0], [0], [1], [0, 0, 1, 1], [], []>} : vector<16x64xbf16>, vector<64x128xbf16>, vector<16x128xf32> -> vector<16x128xf32>
    %c0_15 = arith.constant 0 : index
    %c0_16 = arith.constant 0 : index
    %19 = vector.load %arg7[%c0_15, %c0_16] : memref<1x128xf32, #tpu.memory_space<vmem>>, vector<1x128xf32>
    %20 = vector.broadcast %19 : vector<1x128xf32> to vector<16x128xf32>
    %21 = arith.addf %18, %20 : vector<16x128xf32>
    %cst_17 = arith.constant dense<0xFF800000> : vector<16xf32>
    %22 = vector.multi_reduction <maximumf>, %21, %cst_17 [1] : vector<16x128xf32> to vector<16xf32>
    %23 = vector.shape_cast %22 : vector<16xf32> to vector<16x1xf32>
    %24 = vector.broadcast %23 : vector<16x1xf32> to vector<16x128xf32>
    %25 = arith.subf %21, %24 : vector<16x128xf32>
    %26 = math.exp %25 : vector<16x128xf32>
    %cst_18 = arith.constant dense<0.000000e+00> : vector<16xf32>
    %27 = vector.multi_reduction <add>, %26, %cst_18 [1] : vector<16x128xf32> to vector<16xf32>
    %28 = vector.shape_cast %27 : vector<16xf32> to vector<16x1xf32>
    %29 = math.log %28 : vector<16x1xf32>
    %30 = vector.broadcast %29 : vector<16x1xf32> to vector<16x128xf32>
    %31 = arith.subf %25, %30 : vector<16x128xf32>
    %c0_19 = arith.constant 0 : index
    %c0_20 = arith.constant 0 : index
    %32 = vector.load %arg8[%c0_19, %c0_20] : memref<16x128xf32, #tpu.memory_space<vmem>>, vector<16x128xf32>
    tpu.vector_store %arg8[%c0_19, %c0_20], %31 {strides = array<i32>} : memref<16x128xf32, #tpu.memory_space<vmem>>, vector<16x128xf32>,
    return
  }
  func.func @transform_0(%arg0: i32) -> (i32, i32) {
    %c0_i32 = arith.constant 0 : i32
    %c0_i32_0 = arith.constant 0 : i32
    return %arg0, %c0_i32 : i32, i32
  }
  func.func @transform_1(%arg0: i32) -> (i32, i32) {
    %c0_i32 = arith.constant 0 : i32
    %c0_i32_0 = arith.constant 0 : i32
    %c0_i32_1 = arith.constant 0 : i32
    return %c0_i32, %c0_i32_0 : i32, i32
  }
  func.func @transform_2(%arg0: i32) -> (i32, i32) {
    %c0_i32 = arith.constant 0 : i32
    %c0_i32_0 = arith.constant 0 : i32
    %c0_i32_1 = arith.constant 0 : i32
    return %c0_i32, %c0_i32_0 : i32, i32
  }
  func.func @transform_3(%arg0: i32) -> (i32, i32) {
    %c0_i32 = arith.constant 0 : i32
    %c0_i32_0 = arith.constant 0 : i32
    %c0_i32_1 = arith.constant 0 : i32
    return %c0_i32, %c0_i32_0 : i32, i32
  }
  func.func @transform_4(%arg0: i32) -> (i32, i32) {
    %c0_i32 = arith.constant 0 : i32
    %c0_i32_0 = arith.constant 0 : i32
    %c0_i32_1 = arith.constant 0 : i32
    return %c0_i32, %c0_i32_0 : i32, i32
  }
  func.func @transform_5(%arg0: i32) -> (i32, i32) {
    %c0_i32 = arith.constant 0 : i32
    %c0_i32_0 = arith.constant 0 : i32
    %c0_i32_1 = arith.constant 0 : i32
    return %c0_i32, %c0_i32_0 : i32, i32
  }
  func.func @transform_6(%arg0: i32) -> (i32, i32) {
    %c0_i32 = arith.constant 0 : i32
    %c0_i32_0 = arith.constant 0 : i32
    %c0_i32_1 = arith.constant 0 : i32
    return %c0_i32, %c0_i32_0 : i32, i32
  }
  func.func @transform_7(%arg0: i32) -> (i32, i32) {
    %c0_i32 = arith.constant 0 : i32
    %c0_i32_0 = arith.constant 0 : i32
    return %arg0, %c0_i32 : i32, i32
  }
}

</mosaic_0001>

<bundles_post_ra>
// kernel: tpu_custom_call.1
= control target key start
LH: loop header
LB: loop body
LE: loop exit
PB: predicated region body
PF: predicated region fallthrough
CT: control target
= control target key end

     0   :  { %v459_v1 = vmov 0.0   ;;  %vm460_vm0 = vmmov 0   ;;  %vm50_vm1 = vcmask 130048   ;;  %s567_s0 = inlined_call_operand.vmem [shape: bf16[16,16], index: 0, kind: input, shape index: {}]   ;;  %s568_s1 = inlined_call_operand.vmem [shape: bf16[16,128], index: 1, kind: input, shape index: {}]   ;;  %s569_s2 = inlined_call_operand.vmem [shape: f32[1,128], index: 2, kind: input, shape index: {}]   ;;  %s570_s3 = inlined_call_operand.vmem [shape: bf16[128,64], index: 3, kind: input, shape index: {}]   ;;  %s571_s4 = inlined_call_operand.vmem [shape: f32[1,64], index: 4, kind: input, shape index: {}]   ;;  %s572_s5 = inlined_call_operand.vmem [shape: bf16[64,128], index: 5, kind: input, shape index: {}]   ;;  %s573_s6 = inlined_call_operand.vmem [shape: f32[1,128], index: 6, kind: input, shape index: {}]   ;;  %s574_s7 = inlined_call_operand.hbm [shape: f32[16,128], index: 7, kind: output, shape index: {}]  }
   0x1   :  { %v413_v0 = vld [vmem:[%s568_s1] sm:$0xff]   ;;  %370 = vmatprep.subr.bf16.mxu0 %v459_v1  ;;  %376 = vmatprep.subr.bf16.mxu1 %v459_v1  ;;  %v416_v4 = vld [vmem:[%s570_s3 + $0x8] sm:$0xff]   ;;  %v417_v5 = vld [vmem:[%s570_s3 + $0x10] sm:$0xff]  }
   0x2   :  { %v414_v2 = vld [vmem:[%s567_s0] sm:$0xff]   ;;  %371 = vmatpush3.bf16.msra.mxu0 %v413_v0  ;;  %372 = vmatprep.mubr.msk.bf16.mxu0 %vm460_vm0, %v459_v1  ;;  %v418_v6 = vld [vmem:[%s570_s3 + $0x18] sm:$0xff]  }
   0x3   :  { %v415_v3 = vld [vmem:[%s570_s3] sm:$0xff]   ;;  %392 = vmatprep.mubr.msk.bf16.mxu1 %vm460_vm0, %v459_v1  ;;  %396 = vmatprep.subr.bf16.mxu0 %v459_v1 }
   0x4   :  { %377 = vmatpush3.bf16.msra.mxu1 %v415_v3 }
   0x5   :  { %373 = vmatmul.mubr.msk.bf16.vlgmr.msra.gmra.mrb[0].mxu0 %vm50_vm1, %v414_v2  ;;  %378 = vmatprep.subr.bf16.mxu1 %v459_v1 }
   0x6   :  { %404 = vmatprep.mubr.msk.bf16.mxu0 %vm460_vm0, %v459_v1 }
   0x8   :  { %379 = vmatpush3.bf16.msra.mxu1 %v416_v4 }
   0x9   :  { %380 = vmatprep.subr.bf16.mxu1 %v459_v1 }
   0xc   :  { %381 = vmatpush3.bf16.msra.mxu1 %v417_v5 }
   0xd   :  { %12 = vsyncpa [#allocation3], 0  ;;  %382 = vmatprep.subr.bf16.mxu1 %v459_v1  ;;  %v419_v7 = vld [vmem:[%s570_s3 + $0x20] sm:$0xff]   ;;  %v420_v8 = vld [vmem:[%s570_s3 + $0x28] sm:$0xff]   ;;  %vm252_vm2 = vcmask 523264  }
   0xe   :  { %v421_v9 = vld [vmem:[%s570_s3 + $0x30] sm:$0xff]   ;;  %v422_v10 = vld [vmem:[%s570_s3 + $0x38] sm:$0xff]   ;;  %v423_v11 = vld [vmem:[%s572_s5] sm:$0xff]  }
   0xf   :  { %397 = vmatpush3.bf16.msra.mxu0 %v423_v11  ;;  %v424_v12 = vld [vmem:[%s572_s5 + $0x8] sm:$0xff]   ;;  %v335_v13 = vld [vmem:[%s569_s2] ss:$0 sm:$0xff]  ;;  %v425_v23 = vld [vmem:[%s572_s5 + $0x10] sm:$0xff]  }
  0x10   :  { %383 = vmatpush3.bf16.msra.mxu1 %v418_v6  ;;  %398 = vmatprep.subr.bf16.mxu0 %v459_v1  ;;  %v426_v24 = vld [vmem:[%s572_s5 + $0x18] sm:$0xff]   ;;  %v339_v25 = vld [vmem:[%s571_s4] ss:$0 sm:$0xff]  ;;  %s461_s4 = smov [#allocation2]  }
  0x11   :  { %384 = vmatprep.subr.bf16.mxu1 %v459_v1  ;;  %v348_v35 = vld [vmem:[%s573_s6] ss:$0 sm:$0xff]  ;;  %s324_s5 = sshll.u32 %s461_s4, 4  ;;  %s325_s5 = int_to_ptr.vmem [resolvable:$true] %s324_s5 }
  0x12   :  { %s435_s6 = scalar_lea.vmem %s325_s5, 256  ;;  %p440_p1 = scmp.lt.s32.totalorder %s325_s5, %s325_s5 }
  0x13   :  { %399 = vmatpush3.bf16.msra.mxu0 %v424_v12  ;;  %p436_p0 = scmp.ne.s32.totalorder %s325_s5, %s435_s6  ;;  %p441_p2 = scmp.lt.s32.totalorder %s435_s6, %s435_s6 }
  0x14   :  { %385 = vmatpush3.bf16.msra.mxu1 %v419_v7  ;;  %400 = vmatprep.subr.bf16.mxu0 %v459_v1 }
  0x15   :  { %386 = vmatprep.subr.bf16.mxu1 %v459_v1  ;;  %p442_p3 = por %p441_p2, %p440_p1 }
  0x17   :  { %401 = vmatpush3.bf16.msra.mxu0 %v425_v23  ;;  %p443_p4 = pnand %p442_p3, %p436_p0 }
  0x18   :  { %387 = vmatpush3.bf16.msra.mxu1 %v420_v8  ;;  %402 = vmatprep.subr.bf16.mxu0 %v459_v1 }
  0x19   :  { %388 = vmatprep.subr.bf16.mxu1 %v459_v1 }
  0x1b   :  { %403 = vmatpush3.bf16.msra.mxu0 %v426_v24 }
  0x1c   :  { %389 = vmatpush3.bf16.msra.mxu1 %v421_v9 }
  0x1d   :  { %390 = vmatprep.subr.bf16.mxu1 %v459_v1 }
  0x20   :  { %391 = vmatpush3.bf16.msra.mxu1 %v422_v10 }
  0xd8   :  { %v88_v14 = vpop.f32.mrb[0].mxu0 }
  0xd9   :  { %v89_v15 = vadd.f32 %v335_v13, %v88_v14  ;;  %v374_v16 = vpop.f32.mrb[1].mxu0 }
  0xda   :  { %v91_v17 = vpop.f32.mrb[2].mxu0 }
  0xdb   :  { %v92_v18 = vadd.f32 %v335_v13, %v91_v17  ;;  %v375_v19 = vpop.f32.mrb[3].mxu0  ;;  %v95_v20 = vmax.f32 %v89_v15, 0.0 }
  0xdd   :  { %v96_v21 = vmax.f32 %v92_v18, 0.0 }
  0xdf   :  { %v97_v22 = vpack.c.bf16 %v96_v21, %v95_v20 }
  0xe1   :  { %393 = vmatmul.mubr.bf16.vlgmr.msra.gmra.mrb[0].mxu1 %v97_v22 }
 0x1b4   :  { %v203_v26 = vpop.f32.mrb[0].mxu1 }
 0x1b5   :  { %v204_v27 = vadd.f32 %v339_v25, %v203_v26  ;;  %v394_v28 = vpop.f32.mrb[1].mxu1 }
 0x1b6   :  { %v206_v29 = vpop.f32.mrb[2].mxu1 }
 0x1b7   :  { %v207_v30 = vadd.f32 %v339_v25, %v206_v29  ;;  %v395_v31 = vpop.f32.mrb[3].mxu1  ;;  %v210_v32 = vmax.f32 %v204_v27, 0.0 }
 0x1b9   :  { %v211_v33 = vmax.f32 %v207_v30, 0.0 }
 0x1bb   :  { %v212_v34 = vpack.c.bf16 %v211_v33, %v210_v32 }
 0x1bd   :  { %405 = vmatmul.mubr.msk.bf16.vlgmr.msra.gmra.mrb[4].mxu0 %vm252_vm2, %v212_v34 }
 0x290   :  { %v290_v36 = vpop.f32.mrb[4].mxu0 }
 0x291   :  { %v291_v37 = vadd.f32 %v348_v35, %v290_v36  ;;  %v406_v38 = vpop.f32.mrb[5].mxu0 }
 0x292   :  { %v293_v39 = vpop.f32.mrb[6].mxu0 }
 0x293   :  { %297 = vmax.xlane.f32.xlu0 %v291_v37  ;;  %v407_v40 = vpop.f32.mrb[7].mxu0  ;;  %v294_v41 = vadd.f32 %v348_v35, %v293_v39 }
 0x297   :  { %299 = vmax.xlane.f32.xlu0 %v294_v41 }
 0x320   :  { %v298_v42 = vpop.xlane.xlu0 %297 }
 0x321   :  { %v301_v43 = vsub.f32 %v291_v37, %v298_v42 }
 0x323   :  { %v303_v44 = vmul.f32 1.442695, %v301_v43 }
 0x324   :  { %v300_v45 = vpop.xlane.xlu0 %299 }
 0x325   :  { %v302_v46 = vsub.f32 %v294_v41, %v300_v45  ;;  %427 = vpow2.f32 %v303_v44 }
 0x327   :  { %v305_v47 = vmul.f32 1.442695, %v302_v46 }
 0x329   :  { %429 = vpow2.f32 %v305_v47 }
 0x32f   :  { %v428_v48 = vpop.eup %427 }
 0x330   :  { %307 = vadd.xlane.f32.xlu1 %v428_v48 }
 0x333   :  { %v430_v49 = vpop.eup %429 }
 0x334   :  { %309 = vadd.xlane.f32.xlu1 %v430_v49 }
 0x3bd   :  { %v308_v50 = vpop.xlane.xlu1 %307 }
 0x3be   :  { %431 = vlog2.f32 %v308_v50 }
 0x3c1   :  { %v310_v51 = vpop.xlane.xlu1 %309 }
 0x3c2   :  { %433 = vlog2.f32 %v310_v51 }
 0x3c8   :  { %v432_v52 = vpop.eup %431 }
 0x3c9   :  { %v312_v53 = vmul.f32 0.6931472, %v432_v52 }
 0x3cb   :  { %v315_v54 = vsub.f32 %v301_v43, %v312_v53 }
 0x3cc   :  { %v434_v55 = vpop.eup %433 }
 0x3cd   :  { %317 = vst [vmem:[#allocation2] sm:$0xff] %v315_v54  ;;  %v314_v56 = vmul.f32 0.6931472, %v434_v55 }
 0x3cf   :  { %v316_v57 = vsub.f32 %v302_v46, %v314_v56 }
 0x3d1   :  { %318 = vst [vmem:[#allocation2 + $0x8] sm:$0xff] %v316_v57 }
 0x3d2   :  { %446 = shalt.err (!%p443_p4)
}
 0x3d3   :  { %s447_s8 = scalar_lea.hbm %s574_s7, 256 }
 0x3d4   :  { %p448_p5 = scmp.ne.s32.totalorder %s574_s7, %s447_s8  ;;  %p451_p6 = scmp.lt.u32.totalorder %s447_s8, %s574_s7 }
 0x3d6   :  { %p453_p7 = pnand %p451_p6, %p448_p5 }
 0x3d8   :  { %456 = shalt.err (!%p453_p7)
}
 0x3d9   :  { %s462_s13 = smov 128   ;;  %s463_s14 = smov 8  }
 0x3da   :  { %330 = dma.vmem_to_hbm [thread:$0]  %s325_s5, 256, %s574_s7, [#allocation3], %s462_s13, %s462_s13, %s463_s14  }
 0x3db   :  { %457 = dma.done.wait [#allocation3], 256  }
 0x3dc   :  { %458 = vsyncadd [#allocation3], 4294967040 }
 0x3dd   :  { %334 = vsyncpa [#allocation3], 1 }

</bundles_post_ra>
